<compile_context>
chip_gen: v7x
topology: tpu7x:2x2x1
jax: 0.10.0
libtpu: 0.0.40
codegen_flags: <defaults>
</compile_context>

<pallas_src>
import functools

import jax
import jax.numpy as jnp
from jax.experimental import pallas as pl
from jax.experimental.pallas import tpu as pltpu


def _add_epsilon_kernel(x_ref, o_ref, *, epsilon):
    # x_ref/o_ref: (block_rows, lanes) tiles in VMEM. Pure VPU elementwise add.
    o_ref[...] = x_ref[...] + jnp.asarray(epsilon, dtype=x_ref.dtype)


def _block_budget():
    """(target_block_bytes, vmem_limit_bytes) tuned per TPU generation."""
    kind = ""
    try:
        kind = jax.devices()[0].device_kind.lower()
    except Exception:
        pass
    if "v5 lite" in kind or "v5e" in kind or "v5litepod" in kind:
        # 16 MiB default scoped VMEM: 4x(2 MiB) double-buffered in+out = 8 MiB;
        # ~2 MiB blocks already reach ~85% of the ~0.82 TB/s HBM roofline.
        return 2 << 20, None
    if "v7" in kind:
        # v7x: only 64 MiB physical VMEM. 4 MiB blocks -> 16 MiB double-buffered;
        # keep the scoped limit safely below physical.
        return 4 << 20, 48 << 20
    if "v6" in kind:
        # v6e: 128 MiB VMEM, raise the scoped limit and use bigger blocks.
        return 6 << 20, 64 << 20
    # Unknown generation: conservative default.
    return 2 << 20, None


def add_epsilon(x, epsilon=1e-10, *, force_pallas=False, in_place=False):
    """y = x + epsilon, matching PyTorch AddEpsilon.forward semantics."""
    orig_shape = x.shape
    dtype = x.dtype

    # PyTorch promotes int tensor + python float -> float tensor; adding 1e-10
    # in an integer dtype would truncate to a silent no-op, so promote.
    if jnp.issubdtype(dtype, jnp.integer) or jnp.issubdtype(dtype, jnp.bool_):
        return x.astype(jnp.float32) + jnp.float32(epsilon)

    n = x.size
    itemsize = jnp.dtype(dtype).itemsize
    total_bytes = n * itemsize

    # Small-input short-circuit: fixed pallas_call / grid-step overhead
    # dominates below ~1 MiB; XLA's fused elementwise add is strictly faster.
    if total_bytes < (1 << 20) and not force_pallas:
        return x + jnp.asarray(epsilon, dtype=dtype)

    # Lane width: widest power-of-two multiple of 128 that divides n
    # (fewer, larger DMAs and long unmasked vst runs).
    lanes = 128
    for cand in (2048, 1024, 512, 256):
        if n % cand == 0:
            lanes = cand
            break

    if n % lanes != 0:
        # Element count not a multiple of 128: a single fused XLA add is
        # already at the HBM roofline; avoid pad+slice extra HBM passes.
        return x + jnp.asarray(epsilon, dtype=dtype)

    rows = n // lanes
    x2d = x.reshape(rows, lanes)

    # Sublane multiple depends on packing: f32 -> 8, bf16 -> 16, fp8/int8 -> 32.
    sub = max(8, 32 // itemsize)

    target_block_bytes, vmem_limit = _block_budget()
    if rows <= sub:
        # Tiny row count: full-extent block (always legal, trivially small).
        block_rows = rows
    else:
        block_rows = max(sub, target_block_bytes // (lanes * itemsize))
        block_rows = min(block_rows, rows)
        block_rows -= block_rows % sub  # sublane-aligned; final block may be ragged
        block_rows = max(block_rows, sub)

    grid = (pl.cdiv(rows, block_rows),)

    kernel = functools.partial(_add_epsilon_kernel, epsilon=float(epsilon))

    out2d = pl.pallas_call(
        kernel,
        out_shape=jax.ShapeDtypeStruct((rows, lanes), dtype),
        grid=grid,
        in_specs=[pl.BlockSpec((block_rows, lanes), lambda i: (i, 0))],
        out_specs=pl.BlockSpec((block_rows, lanes), lambda i: (i, 0)),
        compiler_params=pltpu.CompilerParams(
            dimension_semantics=("parallel",),
            vmem_limit_bytes=vmem_limit,
        ),
        cost_estimate=pl.CostEstimate(
            flops=n, transcendentals=0, bytes_accessed=2 * total_bytes
        ),
        # Alias input->output only when requested: without donation XLA must
        # insert a defensive copy, which would cost an extra HBM pass.
        input_output_aliases=({0: 0} if in_place else {}),
    )(x2d)

    return out2d.reshape(orig_shape)


if __name__ == "__main__":
    key = jax.random.PRNGKey(0)
    # NCHW input, consistent with the conv-net context of the module.
    x = jax.random.normal(key, (2, 4, 16, 16), dtype=jnp.float32)
    eps = 1e-10
    ref = x + jnp.float32(eps)

    # Exercise the Pallas kernel path explicitly (the small-input
    # short-circuit would otherwise bypass it for this 8 KiB demo tensor).
    y = add_epsilon(x, epsilon=eps, force_pallas=True)
    y = jax.block_until_ready(y)
    assert y.shape == x.shape and y.dtype == x.dtype
    assert jnp.allclose(y, ref), "Pallas path mismatch vs reference"

    # Default path (small-input short-circuit) must agree as well.
    y2 = jax.block_until_ready(add_epsilon(x, epsilon=eps))
    assert jnp.allclose(y2, ref), "short-circuit path mismatch vs reference"

    print("KERNEL_OK")
</pallas_src>

<mosaic_0001>
module attributes {stable_mosaic.version = 11 : i64} {
  func.func @_add_epsilon_kernel(%arg0: i32, %arg1: memref<1x2048xf32, #tpu.memory_space<vmem>>, %arg2: memref<1x2048xf32, #tpu.memory_space<vmem>>) attributes {dimension_semantics = [#tpu.dimension_semantics<parallel>], iteration_bounds = array<i64: 1>, scalar_prefetch = 0 : i64, scratch_operands = 0 : i64, tpu.core_type = #tpu.core_type<tc>, window_params = [{transform_indices = @transform_0, window_bounds = array<i64: 1, 2048>}, {transform_indices = @transform_1, window_bounds = array<i64: 1, 2048>}]} {
    %c0 = arith.constant 0 : index
    %c0_0 = arith.constant 0 : index
    %0 = vector.load %arg1[%c0, %c0_0] : memref<1x2048xf32, #tpu.memory_space<vmem>>, vector<1x2048xf32>
    %cst = arith.constant 1.000000e-10 : f32
    %1 = vector.broadcast %cst : f32 to vector<1x2048xf32>
    %2 = arith.addf %0, %1 : vector<1x2048xf32>
    %c0_1 = arith.constant 0 : index
    %c0_2 = arith.constant 0 : index
    %3 = vector.load %arg2[%c0_1, %c0_2] : memref<1x2048xf32, #tpu.memory_space<vmem>>, vector<1x2048xf32>
    tpu.vector_store %arg2[%c0_1, %c0_2], %2 {strides = array<i32>} : memref<1x2048xf32, #tpu.memory_space<vmem>>, vector<1x2048xf32>,
    return
  }
  func.func @transform_0(%arg0: i32) -> (i32, i32) {
    %c0_i32 = arith.constant 0 : i32
    %c0_i32_0 = arith.constant 0 : i32
    return %arg0, %c0_i32 : i32, i32
  }
  func.func @transform_1(%arg0: i32) -> (i32, i32) {
    %c0_i32 = arith.constant 0 : i32
    %c0_i32_0 = arith.constant 0 : i32
    return %arg0, %c0_i32 : i32, i32
  }
}

</mosaic_0001>

<bundles_post_ra>
// kernel: tpu_custom_call.1
= control target key start
LH: loop header
LB: loop body
LE: loop exit
PB: predicated region body
PF: predicated region fallthrough
CT: control target
= control target key end

     0   :  { %6 = vsyncpa [#allocation3], 0  ;;  %s128_s0 = inlined_call_operand.hbm [shape: f32[1,2048], index: 0, kind: input, shape index: {}]   ;;  %s129_s1 = inlined_call_operand.hbm [shape: f32[1,2048], index: 1, kind: output, shape index: {}]  }
   0x1   :  { %7 = vsyncpa [#allocation4], 0  ;;  %s92_s6 = smov [#allocation2]   ;;  %s44_s10 = scalar_lea.hbm %s128_s0, 256 }
   0x2   :  { %s14_s7 = sshll.u32 %s92_s6, 4  ;;  %p45_p0 = scmp.ne.s32.totalorder %s128_s0, %s44_s10  ;;  %s15_s7 = int_to_ptr.vmem [resolvable:$true] %s14_s7 }
   0x3   :  { %p48_p1 = scmp.lt.u32.totalorder %s44_s10, %s128_s0 }
   0x5   :  { %p50_p2 = pnand %p48_p1, %p45_p0 }
   0x7   :  { %53 = shalt.err (!%p50_p2)
}
   0x8   :  { %s54_s15 = scalar_lea.vmem %s15_s7, 256  ;;  %p59_p4 = scmp.lt.s32.totalorder %s15_s7, %s15_s7 }
   0x9   :  { %p55_p3 = scmp.ne.s32.totalorder %s15_s7, %s54_s15  ;;  %p60_p5 = scmp.lt.s32.totalorder %s54_s15, %s54_s15 }
   0xb   :  { %p61_p6 = por %p60_p5, %p59_p4 }
   0xd   :  { %p62_p7 = pnand %p61_p6, %p55_p3 }
   0xf   :  { %65 = shalt.err (!%p62_p7)
}
  0x10   :  { %17 = dma.hbm_to_vmem [thread:$0]  %s128_s0, 256, %s15_s7, [#allocation3]  }
  0x11   :  { %88 = dma.done.wait [#allocation3], 256  }
  0x12   :  { %89 = vsyncadd [#allocation3], 4294967040  ;;  %s93_s18 = smov [#allocation5]   ;;  %v21_v0 = vld [vmem:[#allocation2] sm:$0xff]  ;;  %v22_v1 = vld [vmem:[#allocation2 + $0x8] sm:$0xff] }
  0x13   :  { %s33_s19 = sshll.u32 %s93_s18, 4  ;;  %v23_v2 = vadd.f32 1e-10, %v21_v0  ;;  %v24_v3 = vadd.f32 1e-10, %v22_v1  ;;  %s34_s19 = int_to_ptr.vmem [resolvable:$true] %s33_s19 }
  0x14   :  { %s66_s20 = scalar_lea.vmem %s34_s19, 256  ;;  %p71_p9 = scmp.lt.s32.totalorder %s34_s19, %s34_s19 }
  0x15   :  { %25 = vst [vmem:[#allocation5] sm:$0xff] %v23_v2  ;;  %26 = vst [vmem:[#allocation5 + $0x8] sm:$0xff] %v24_v3  ;;  %p67_p8 = scmp.ne.s32.totalorder %s34_s19, %s66_s20  ;;  %p72_p10 = scmp.lt.s32.totalorder %s66_s20, %s66_s20 }
  0x17   :  { %p73_p11 = por %p72_p10, %p71_p9 }
  0x19   :  { %p74_p12 = pnand %p73_p11, %p67_p8 }
  0x1b   :  { %77 = shalt.err (!%p74_p12)
}
  0x1c   :  { %s78_s22 = scalar_lea.hbm %s129_s1, 256 }
  0x1d   :  { %p79_p13 = scmp.ne.s32.totalorder %s129_s1, %s78_s22  ;;  %p82_p0 = scmp.lt.u32.totalorder %s78_s22, %s129_s1 }
  0x1f   :  { %p84_p1 = pnand %p82_p0, %p79_p13 }
  0x21   :  { %87 = shalt.err (!%p84_p1)
}
  0x22   :  { %36 = dma.vmem_to_hbm [thread:$0]  %s34_s19, 256, %s129_s1, [#allocation4]  }
  0x23   :  { %90 = dma.done.wait [#allocation4], 256  }
  0x24   :  { %91 = vsyncadd [#allocation4], 4294967040 }
  0x25   :  { %40 = vsyncpa [#allocation3], 1 }
  0x26   :  { %41 = vsyncpa [#allocation4], 1 }

</bundles_post_ra>
